<compile_context>
chip_gen: v7x
topology: tpu7x:2x2x1
jax: 0.10.0
libtpu: 0.0.40
codegen_flags: <defaults>
</compile_context>

<pallas_src>
import functools

import jax
import jax.numpy as jnp
from jax import lax
from jax.experimental import pallas as pl
from jax.experimental.pallas import tpu as pltpu

ALPHA = 0.25
GAMMA = 2.0

_SMALL_INPUT_THRESHOLD = 1 << 18          # below this, plain XLA wins
_DEFAULT_BLOCK_BYTES = 2 << 20            # per-input block bytes (unknown chip)


def _round_up(x, m):
    return (x + m - 1) // m * m


def _max_block_bytes_per_input():
    """Per-input HBM->VMEM block size, sized per TPU generation."""
    try:
        kind = jax.devices()[0].device_kind.lower()
    except Exception:  # pragma: no cover - defensive
        return _DEFAULT_BLOCK_BYTES
    if "v7" in kind:
        return 8 << 20      # v7x: ~3.2 TB/s HBM, 64 MiB VMEM -> big blocks
    if "v6" in kind:
        return 4 << 20      # v6e: 16 MiB double-buffered fits default VMEM
    return 2 << 20          # v5e / older: keep 1024-row f32 blocks


def _bce_focal_kernel(p_ref, t_ref, partial_ref, *, alpha, gamma,
                      valid_rows, tile_r, lane_w):
    p = p_ref[...].astype(jnp.float32)
    t = t_ref[...].astype(jnp.float32)

    if valid_rows % tile_r != 0:
        # Ragged last block: zero OOB rows BEFORE the logs so garbage never
        # reaches the transcendentals (p = t = 0 contributes exactly 0 loss).
        row = (pl.program_id(0) * tile_r
               + lax.broadcasted_iota(jnp.int32, (tile_r, 1), 0))
        valid = row < valid_rows
        p = jnp.where(valid, p, 0.0)
        t = jnp.where(valid, t, 0.0)

    # Cheap insurance: p must be a probability (PyTorch BCELoss would assert
    # on out-of-range inputs; clip keeps bf16 rounding from producing NaN).
    p = jnp.clip(p, 0.0, 1.0)

    one_m_p = 1.0 - p
    one_m_t = 1.0 - t

    log_p_raw = jnp.log(p)
    log_1mp_raw = jnp.log(one_m_p)
    # nn.BCELoss(reduction='none') clamps each log term at -100 (PyTorch
    # semantics); this also makes padded (p=0, t=0) elements contribute 0.
    bce = -(t * jnp.maximum(log_p_raw, -100.0)
            + one_m_t * jnp.maximum(log_1mp_raw, -100.0))

    # Focal weight.
    if gamma == 2.0:
        # Default path: plain squares on the VPU, no EUP pow.
        w_pos = one_m_p * one_m_p
        w_neg = p * p
    else:
        # Reuse the logs already computed: exp(g*log(x)) instead of x**g
        # (saves two extra EUP transcendentals per element).
        w_pos = jnp.exp(gamma * log_1mp_raw)
        w_neg = jnp.exp(gamma * log_p_raw)

    loss = (t * (alpha * w_pos) + one_m_t * w_neg) * bce

    # Fold rows in groups of 8 -> (8, W) partial: leading-axis sum over whole
    # vregs, pure elementwise VPU adds, no XLU cross-lane reduce.
    partial_ref[...] = jnp.sum(loss.reshape(tile_r // 8, 8, lane_w), axis=0)


def _bce_focal_dense(preds, targets, alpha, gamma):
    """Single fused XLA expression — fast path for small inputs."""
    p = preds.astype(jnp.float32)
    t = targets.astype(jnp.float32)
    log_p = jnp.maximum(jnp.log(p), -100.0)
    log_1mp = jnp.maximum(jnp.log(1.0 - p), -100.0)
    bce = -(t * log_p + (1.0 - t) * log_1mp)
    loss = (t * alpha * (1.0 - p) ** gamma * bce
            + (1.0 - t) * p ** gamma * bce)
    return loss.mean()


def bce_focal_loss(preds, targets, *, alpha=ALPHA, gamma=GAMMA,
                   force_pallas=False):
    """BCE focal loss with mean reduction (matches the PyTorch module)."""
    assert preds.shape == targets.shape
    n = int(preds.size)
    assert n > 0

    if not force_pallas and n < _SMALL_INPUT_THRESHOLD:
        # Dispatch + per-step overhead dominates at this size; a single fused
        # XLA elementwise+reduce is strictly faster.
        return _bce_focal_dense(preds, targets, alpha, gamma)

    # Flatten (free reshape) and pick the widest lane width that tiles n.
    p_flat = jnp.ravel(preds)
    t_flat = jnp.ravel(targets)
    n_pad = _round_up(n, 128)
    if n_pad % 512 == 0:
        w = 512
    elif n_pad % 256 == 0:
        w = 256
    else:
        w = 128
    if n_pad != n:
        # Rare ragged fallback: minimal (<128 element) zero pad so the flat
        # array reshapes to (rows, w).  Padded p = t = 0 contributes 0 loss.
        p_flat = jnp.pad(p_flat, (0, n_pad - n))
        t_flat = jnp.pad(t_flat, (0, n_pad - n))
    rows = n_pad // w
    p2 = p_flat.reshape(rows, w)
    t2 = t_flat.reshape(rows, w)

    # Block sizing: per-generation byte budget per input block; dtype-aware so
    # bf16 inputs get twice the rows per step at the same DMA size.
    itemsize = max(p2.dtype.itemsize, t2.dtype.itemsize)
    max_rows = max(8, (_max_block_bytes_per_input() // (w * itemsize)) // 8 * 8)
    tile_r = min(max_rows, _round_up(rows, 8))
    grid_steps = -(-rows // tile_r)

    # Double-buffered inputs + double-buffered (8, w) f32 output, plus slack.
    vmem_needed = (2 * tile_r * w * (p2.dtype.itemsize + t2.dtype.itemsize)
                   + 2 * 8 * w * 4)
    vmem_limit = max(32 << 20, vmem_needed + (4 << 20))

    kernel = functools.partial(
        _bce_focal_kernel, alpha=float(alpha), gamma=float(gamma),
        valid_rows=rows, tile_r=tile_r, lane_w=w)

    partials = pl.pallas_call(
        kernel,
        out_shape=jax.ShapeDtypeStruct((grid_steps * 8, w), jnp.float32),
        grid_spec=pltpu.PrefetchScalarGridSpec(
            num_scalar_prefetch=0,
            grid=(grid_steps,),
            in_specs=[
                pl.BlockSpec((tile_r, w), lambda i: (i, 0)),
                pl.BlockSpec((tile_r, w), lambda i: (i, 0)),
            ],
            out_specs=pl.BlockSpec((8, w), lambda i: (i, 0)),
        ),
        compiler_params=pltpu.CompilerParams(
            dimension_semantics=("parallel",),
            vmem_limit_bytes=int(vmem_limit)),
    )(p2, t2)

    # Tiny second-stage reduction + mean over the ORIGINAL element count.
    return jnp.sum(partials) / jnp.float32(n)


def bce_focal_loss_ref(preds, targets, alpha=ALPHA, gamma=GAMMA):
    """Pure-JAX reference mirroring the PyTorch module."""
    log_p = jnp.maximum(jnp.log(preds), -100.0)
    log_1mp = jnp.maximum(jnp.log(1.0 - preds), -100.0)
    bce = -(targets * log_p + (1.0 - targets) * log_1mp)
    loss = (targets * alpha * (1.0 - preds) ** gamma * bce
            + (1.0 - targets) * preds ** gamma * bce)
    return loss.mean()


if __name__ == "__main__":
    key = jax.random.PRNGKey(0)
    k1, k2, k3, k4 = jax.random.split(key, 4)

    # Shipped shape: (batch, classes) multi-label probabilities / targets.
    B, C = 16, 256
    preds = jax.nn.sigmoid(jax.random.normal(k1, (B, C), jnp.float32))
    targets = (jax.random.uniform(k2, (B, C), jnp.float32) < 0.1).astype(
        jnp.float32)

    out = jax.block_until_ready(bce_focal_loss(preds, targets,
                                               force_pallas=True))
    ref = bce_focal_loss_ref(preds, targets)
    assert jnp.allclose(out, ref, rtol=1e-4, atol=1e-6), (out, ref)

    # Auto path (small-input fast path, no pallas dispatch).
    out_fast = jax.block_until_ready(bce_focal_loss(preds, targets))
    assert jnp.allclose(out_fast, ref, rtol=1e-4, atol=1e-6), (out_fast, ref)

    # Ragged shape: exercises the minimal-pad fallback + in-kernel row mask.
    preds2 = jax.nn.sigmoid(jax.random.normal(k3, (9, 600), jnp.float32))
    targets2 = (jax.random.uniform(k4, (9, 600), jnp.float32) < 0.1).astype(
        jnp.float32)
    out2 = jax.block_until_ready(bce_focal_loss(preds2, targets2,
                                                force_pallas=True))
    ref2 = bce_focal_loss_ref(preds2, targets2)
    assert jnp.allclose(out2, ref2, rtol=1e-4, atol=1e-6), (out2, ref2)

    print("KERNEL_OK")
</pallas_src>

<mosaic_0001>
module attributes {stable_mosaic.version = 11 : i64} {
  func.func @_bce_focal_kernel(%arg0: i32, %arg1: memref<8x512xf32, #tpu.memory_space<vmem>>, %arg2: memref<8x512xf32, #tpu.memory_space<vmem>>, %arg3: memref<8x512xf32, #tpu.memory_space<vmem>>) attributes {dimension_semantics = [#tpu.dimension_semantics<parallel>], iteration_bounds = array<i64: 1>, scalar_prefetch = 0 : i64, scratch_operands = 0 : i64, tpu.core_type = #tpu.core_type<tc>, window_params = [{transform_indices = @transform_0, window_bounds = array<i64: 8, 512>}, {transform_indices = @transform_1, window_bounds = array<i64: 8, 512>}, {transform_indices = @transform_2, window_bounds = array<i64: 8, 512>}]} {
    %c0 = arith.constant 0 : index
    %c0_0 = arith.constant 0 : index
    %0 = vector.load %arg1[%c0, %c0_0] : memref<8x512xf32, #tpu.memory_space<vmem>>, vector<8x512xf32>
    %c0_1 = arith.constant 0 : index
    %c0_2 = arith.constant 0 : index
    %1 = vector.load %arg2[%c0_1, %c0_2] : memref<8x512xf32, #tpu.memory_space<vmem>>, vector<8x512xf32>
    %cst = arith.constant 0.000000e+00 : f32
    %cst_3 = arith.constant 1.000000e+00 : f32
    %2 = vector.broadcast %cst : f32 to vector<8x512xf32>
    %3 = arith.maximumf %2, %0 : vector<8x512xf32>
    %4 = vector.broadcast %cst_3 : f32 to vector<8x512xf32>
    %5 = arith.minimumf %4, %3 : vector<8x512xf32>
    %cst_4 = arith.constant 1.000000e+00 : f32
    %6 = vector.broadcast %cst_4 : f32 to vector<8x512xf32>
    %7 = arith.subf %6, %5 : vector<8x512xf32>
    %cst_5 = arith.constant 1.000000e+00 : f32
    %8 = vector.broadcast %cst_5 : f32 to vector<8x512xf32>
    %9 = arith.subf %8, %1 : vector<8x512xf32>
    %10 = math.log %5 : vector<8x512xf32>
    %11 = math.log %7 : vector<8x512xf32>
    %cst_6 = arith.constant -1.000000e+02 : f32
    %12 = vector.broadcast %cst_6 : f32 to vector<8x512xf32>
    %13 = arith.maximumf %10, %12 : vector<8x512xf32>
    %14 = arith.mulf %1, %13 : vector<8x512xf32>
    %cst_7 = arith.constant -1.000000e+02 : f32
    %15 = vector.broadcast %cst_7 : f32 to vector<8x512xf32>
    %16 = arith.maximumf %11, %15 : vector<8x512xf32>
    %17 = arith.mulf %9, %16 : vector<8x512xf32>
    %18 = arith.addf %14, %17 : vector<8x512xf32>
    %cst_8 = arith.constant 0.000000e+00 : f32
    %19 = vector.broadcast %cst_8 : f32 to vector<8x512xf32>
    %20 = arith.subf %19, %18 : vector<8x512xf32>
    %21 = arith.mulf %7, %7 : vector<8x512xf32>
    %22 = arith.mulf %5, %5 : vector<8x512xf32>
    %cst_9 = arith.constant 2.500000e-01 : f32
    %23 = vector.broadcast %cst_9 : f32 to vector<8x512xf32>
    %24 = arith.mulf %23, %21 : vector<8x512xf32>
    %25 = arith.mulf %1, %24 : vector<8x512xf32>
    %26 = arith.mulf %9, %22 : vector<8x512xf32>
    %27 = arith.addf %25, %26 : vector<8x512xf32>
    %28 = arith.mulf %27, %20 : vector<8x512xf32>
    %29 = vector.shape_cast %28 : vector<8x512xf32> to vector<1x8x512xf32>
    %cst_10 = arith.constant dense<0.000000e+00> : vector<8x512xf32>
    %30 = vector.multi_reduction <add>, %29, %cst_10 [0] : vector<1x8x512xf32> to vector<8x512xf32>
    %c0_11 = arith.constant 0 : index
    %c0_12 = arith.constant 0 : index
    %31 = vector.load %arg3[%c0_11, %c0_12] : memref<8x512xf32, #tpu.memory_space<vmem>>, vector<8x512xf32>
    tpu.vector_store %arg3[%c0_11, %c0_12], %30 {strides = array<i32>} : memref<8x512xf32, #tpu.memory_space<vmem>>, vector<8x512xf32>,
    return
  }
  func.func @transform_0(%arg0: i32) -> (i32, i32) {
    %c0_i32 = arith.constant 0 : i32
    %c0_i32_0 = arith.constant 0 : i32
    return %arg0, %c0_i32 : i32, i32
  }
  func.func @transform_1(%arg0: i32) -> (i32, i32) {
    %c0_i32 = arith.constant 0 : i32
    %c0_i32_0 = arith.constant 0 : i32
    return %arg0, %c0_i32 : i32, i32
  }
  func.func @transform_2(%arg0: i32) -> (i32, i32) {
    %c0_i32 = arith.constant 0 : i32
    %c0_i32_0 = arith.constant 0 : i32
    return %arg0, %c0_i32 : i32, i32
  }
}

</mosaic_0001>

<bundles_post_ra>
// kernel: tpu_custom_call.1
= control target key start
LH: loop header
LB: loop body
LE: loop exit
PB: predicated region body
PF: predicated region fallthrough
CT: control target
= control target key end

     0   :  { %7 = vsyncpa [#allocation3], 0  ;;  %s297_s0 = inlined_call_operand.hbm [shape: f32[8,512], index: 0, kind: input, shape index: {}]   ;;  %s298_s1 = inlined_call_operand.hbm [shape: f32[8,512], index: 1, kind: input, shape index: {}]   ;;  %s299_s2 = inlined_call_operand.hbm [shape: f32[8,512], index: 2, kind: output, shape index: {}]  }
   0x1   :  { %8 = vsyncpa [#allocation6], 0 }
   0x2   :  { %9 = vsyncpa [#allocation4], 0  ;;  %s243_s9 = smov [#allocation2]   ;;  %s244_s11 = smov [#allocation5]  }
   0x3   :  { %s16_s10 = sshll.u32 %s243_s9, 4  ;;  %s26_s12 = sshll.u32 %s244_s11, 4  ;;  %s17_s10 = int_to_ptr.vmem [resolvable:$true] %s16_s10  ;;  %s27_s12 = int_to_ptr.vmem [resolvable:$true] %s26_s12 }
   0x4   :  { %s171_s15 = scalar_lea.hbm %s297_s0, 512 }
   0x5   :  { %p172_p0 = scmp.ne.s32.totalorder %s297_s0, %s171_s15  ;;  %p175_p1 = scmp.lt.u32.totalorder %s171_s15, %s297_s0 }
   0x7   :  { %p177_p2 = pnand %p175_p1, %p172_p0 }
   0x9   :  { %180 = shalt.err (!%p177_p2)
}
   0xa   :  { %s181_s20 = scalar_lea.vmem %s17_s10, 512  ;;  %p186_p4 = scmp.lt.s32.totalorder %s17_s10, %s17_s10 }
   0xb   :  { %p182_p3 = scmp.ne.s32.totalorder %s17_s10, %s181_s20  ;;  %p187_p5 = scmp.lt.s32.totalorder %s181_s20, %s181_s20 }
   0xd   :  { %p188_p6 = por %p187_p5, %p186_p4 }
   0xf   :  { %p189_p7 = pnand %p188_p6, %p182_p3 }
  0x11   :  { %192 = shalt.err (!%p189_p7)
}
  0x12   :  { %19 = dma.hbm_to_vmem [thread:$0]  %s297_s0, 512, %s17_s10, [#allocation3]  }
  0x13   :  { %s193_s25 = scalar_lea.hbm %s298_s1, 512 }
  0x14   :  { %p194_p8 = scmp.ne.s32.totalorder %s298_s1, %s193_s25  ;;  %p197_p9 = scmp.lt.u32.totalorder %s193_s25, %s298_s1 }
  0x16   :  { %p199_p10 = pnand %p197_p9, %p194_p8 }
  0x18   :  { %202 = shalt.err (!%p199_p10)
}
  0x19   :  { %s203_s30 = scalar_lea.vmem %s27_s12, 512  ;;  %p208_p12 = scmp.lt.s32.totalorder %s27_s12, %s27_s12 }
  0x1a   :  { %p204_p11 = scmp.ne.s32.totalorder %s27_s12, %s203_s30  ;;  %p209_p13 = scmp.lt.s32.totalorder %s203_s30, %s203_s30 }
  0x1c   :  { %p210_p0 = por %p209_p13, %p208_p12 }
  0x1e   :  { %p211_p1 = pnand %p210_p0, %p204_p11 }
  0x20   :  { %214 = shalt.err (!%p211_p1)
}
  0x21   :  { %29 = dma.hbm_to_vmem [thread:$0]  %s298_s1, 512, %s27_s12, [#allocation6]  }
  0x22   :  { %237 = dma.done.wait [#allocation3], 512  }
  0x23   :  { %238 = vsyncadd [#allocation3], 4294966784 }
  0x24   :  { %239 = dma.done.wait [#allocation6], 512  }
  0x25   :  { %240 = vsyncadd [#allocation6], 4294966784  ;;  %v36_v0 = vld [vmem:[#allocation2] sm:$0xff]  ;;  %v37_v1 = vld [vmem:[#allocation2 + $0x8] sm:$0xff]  ;;  %s245_s1 = smov [#allocation7]  }
  0x26   :  { %v44_v2 = vmax.f32 %v36_v0, 0.0  ;;  %v45_v3 = vmax.f32 %v37_v1, 0.0  ;;  %v38_v4 = vld [vmem:[#allocation2 + $0x10] sm:$0xff]  ;;  %v39_v6 = vld [vmem:[#allocation2 + $0x18] sm:$0xff]  ;;  %v40_v17 = vld [vmem:[#allocation5] sm:$0xff]  ;;  %s142_s4 = sshll.u32 %s245_s1, 4  ;;  %s143_s4 = int_to_ptr.vmem [resolvable:$true] %s142_s4 }
  0x27   :  { %v46_v5 = vmax.f32 %v38_v4, 0.0  ;;  %v47_v12 = vmax.f32 %v39_v6, 0.0  ;;  %v41_v18 = vld [vmem:[#allocation5 + $0x8] sm:$0xff]  ;;  %v42_v22 = vld [vmem:[#allocation5 + $0x10] sm:$0xff]  ;;  %v43_v24 = vld [vmem:[#allocation5 + $0x18] sm:$0xff]  ;;  %v56_v26 = vsub.f32 1.0, %v40_v17  ;;  %p220_p3 = scmp.lt.s32.totalorder %s143_s4, %s143_s4 }
  0x28   :  { %v48_v7 = vmin.f32 %v44_v2, 1.0  ;;  %v49_v8 = vmin.f32 %v45_v3, 1.0  ;;  %v57_v28 = vsub.f32 1.0, %v41_v18  ;;  %v58_v33 = vsub.f32 1.0, %v42_v22  ;;  %s215_s5 = scalar_lea.vmem %s143_s4, 512 }
  0x29   :  { %v50_v9 = vmin.f32 %v46_v5, 1.0  ;;  %v51_v14 = vmin.f32 %v47_v12, 1.0  ;;  %v59_v38 = vsub.f32 1.0, %v43_v24  ;;  %p216_p2 = scmp.ne.s32.totalorder %s143_s4, %s215_s5  ;;  %p221_p4 = scmp.lt.s32.totalorder %s215_s5, %s215_s5 }
  0x2a   :  { %v52_v10 = vsub.f32 1.0, %v48_v7  ;;  %155 = vlog2.f32 %v48_v7  ;;  %v53_v11 = vsub.f32 1.0, %v49_v8  ;;  %v104_v20 = vmul.f32 %v48_v7, %v48_v7 }
  0x2b   :  { %157 = vlog2.f32 %v49_v8  ;;  %v54_v13 = vsub.f32 1.0, %v50_v9  ;;  %v55_v16 = vsub.f32 1.0, %v51_v14  ;;  %v105_v21 = vmul.f32 %v49_v8, %v49_v8  ;;  %p222_p5 = por %p221_p4, %p220_p3 }
  0x2c   :  { %159 = vlog2.f32 %v52_v10  ;;  %v100_v15 = vmul.f32 %v52_v10, %v52_v10  ;;  %v101_v19 = vmul.f32 %v53_v11, %v53_v11  ;;  %v106_v23 = vmul.f32 %v50_v9, %v50_v9 }
  0x2d   :  { %161 = vlog2.f32 %v53_v11  ;;  %v102_v29 = vmul.f32 %v54_v13, %v54_v13  ;;  %v116_v35 = vmul.f32 %v104_v20, %v56_v26  ;;  %v117_v37 = vmul.f32 %v105_v21, %v57_v28  ;;  %p223_p6 = pnand %p222_p5, %p216_p2 }
  0x2e   :  { %163 = vlog2.f32 %v50_v9  ;;  %v108_v27 = vmul.f32 0.25, %v100_v15  ;;  %v109_v32 = vmul.f32 0.25, %v101_v19  ;;  %v118_v42 = vmul.f32 %v106_v23, %v58_v33 }
  0x2f   :  { %165 = vlog2.f32 %v54_v13  ;;  %v103_v43 = vmul.f32 %v55_v16, %v55_v16  ;;  %v110_v48 = vmul.f32 0.25, %v102_v29  ;;  %v107_v58 = vmul.f32 %v51_v14, %v51_v14 }
  0x30   :  { %167 = vlog2.f32 %v51_v14  ;;  %v112_v45 = vmul.f32 %v108_v27, %v40_v17  ;;  %v113_v52 = vmul.f32 %v109_v32, %v41_v18 }
  0x31   :  { %169 = vlog2.f32 %v55_v16  ;;  %v111_v62 = vmul.f32 0.25, %v103_v43  ;;  %v114_v3 = vmul.f32 %v110_v48, %v42_v22  ;;  %v119_v11 = vmul.f32 %v107_v58, %v59_v38 }
  0x32   :  { %v120_v0 = vadd.f32 %v116_v35, %v112_v45  ;;  %v121_v9 = vadd.f32 %v117_v37, %v113_v52 }
  0x33   :  { %v115_v15 = vmul.f32 %v111_v62, %v43_v24 }
  0x34   :  { %v156_v25 = vpop.eup %155 }
  0x35   :  { %v158_v30 = vpop.eup %157  ;;  %v61_v31 = vmul.f32 0.6931472, %v156_v25 }
  0x36   :  { %v160_v34 = vpop.eup %159  ;;  %v63_v36 = vmul.f32 0.6931472, %v158_v30 }
  0x37   :  { %v162_v39 = vpop.eup %161  ;;  %v69_v40 = vmul.f32 0.6931472, %v160_v34  ;;  %v76_v41 = vmax.f32 %v61_v31, -100.0 }
  0x38   :  { %v164_v44 = vpop.eup %163  ;;  %v71_v46 = vmul.f32 0.6931472, %v162_v39  ;;  %v77_v47 = vmax.f32 %v63_v36, -100.0 }
  0x39   :  { %v166_v49 = vpop.eup %165  ;;  %v80_v50 = vmul.f32 %v76_v41, %v40_v17  ;;  %v84_v51 = vmax.f32 %v69_v40, -100.0  ;;  %v65_v53 = vmul.f32 0.6931472, %v164_v44 }
  0x3a   :  { %v168_v54 = vpop.eup %167  ;;  %v81_v55 = vmul.f32 %v77_v47, %v41_v18  ;;  %v85_v56 = vmax.f32 %v71_v46, -100.0  ;;  %v73_v57 = vmul.f32 0.6931472, %v166_v49  ;;  %v122_v18 = vadd.f32 %v118_v42, %v114_v3 }
  0x3b   :  { %v88_v59 = vmul.f32 %v84_v51, %v56_v26  ;;  %v78_v60 = vmax.f32 %v65_v53, -100.0  ;;  %v67_v61 = vmul.f32 0.6931472, %v168_v54  ;;  %v170_v63 = vpop.eup %169 }
  0x3c   :  { %v89_v1 = vmul.f32 %v85_v56, %v57_v28  ;;  %v86_v2 = vmax.f32 %v73_v57, -100.0  ;;  %v75_v6 = vmul.f32 0.6931472, %v170_v63 }
  0x3d   :  { %v92_v4 = vadd.f32 %v88_v59, %v80_v50  ;;  %v82_v5 = vmul.f32 %v78_v60, %v42_v22  ;;  %v79_v7 = vmax.f32 %v67_v61, -100.0  ;;  %v123_v22 = vadd.f32 %v119_v11, %v115_v15 }
  0x3e   :  { %v93_v8 = vadd.f32 %v89_v1, %v81_v55  ;;  %v90_v10 = vmul.f32 %v86_v2, %v58_v33  ;;  %v87_v14 = vmax.f32 %v75_v6, -100.0 }
  0x3f   :  { %v96_v12 = vsub.f32 0.0, %v92_v4  ;;  %v83_v13 = vmul.f32 %v79_v7, %v43_v24 }
  0x40   :  { %v97_v16 = vsub.f32 0.0, %v93_v8  ;;  %v94_v17 = vadd.f32 %v90_v10, %v82_v5  ;;  %v91_v20 = vmul.f32 %v87_v14, %v59_v38 }
  0x41   :  { %v124_v19 = vmul.f32 %v120_v0, %v96_v12 }
  0x42   :  { %v125_v21 = vmul.f32 %v121_v9, %v97_v16  ;;  %v98_v23 = vsub.f32 0.0, %v94_v17  ;;  %v95_v25 = vadd.f32 %v91_v20, %v83_v13 }
  0x43   :  { %132 = vst [vmem:[#allocation7] sm:$0xff] %v124_v19 }
  0x44   :  { %133 = vst [vmem:[#allocation7 + $0x8] sm:$0xff] %v125_v21  ;;  %v126_v26 = vmul.f32 %v122_v18, %v98_v23  ;;  %v99_v27 = vsub.f32 0.0, %v95_v25 }
  0x46   :  { %134 = vst [vmem:[#allocation7 + $0x10] sm:$0xff] %v126_v26  ;;  %v127_v28 = vmul.f32 %v123_v22, %v99_v27 }
  0x48   :  { %135 = vst [vmem:[#allocation7 + $0x18] sm:$0xff] %v127_v28 }
  0x49   :  { %226 = shalt.err (!%p223_p6)
}
  0x4a   :  { %s227_s8 = scalar_lea.hbm %s299_s2, 512 }
  0x4b   :  { %p228_p7 = scmp.ne.s32.totalorder %s299_s2, %s227_s8  ;;  %p231_p8 = scmp.lt.u32.totalorder %s227_s8, %s299_s2 }
  0x4d   :  { %p233_p9 = pnand %p231_p8, %p228_p7 }
  0x4f   :  { %236 = shalt.err (!%p233_p9)
}
  0x50   :  { %145 = dma.vmem_to_hbm [thread:$0]  %s143_s4, 512, %s299_s2, [#allocation4]  }
  0x51   :  { %241 = dma.done.wait [#allocation4], 512  }
  0x52   :  { %242 = vsyncadd [#allocation4], 4294966784 }
  0x53   :  { %149 = vsyncpa [#allocation3], 1 }
  0x54   :  { %150 = vsyncpa [#allocation6], 1 }
  0x55   :  { %151 = vsyncpa [#allocation4], 1 }

</bundles_post_ra>
